<compile_context>
chip_gen: v5e
topology: v5e:2x2
jax: 0.10.0
libtpu: 0.0.40
codegen_flags: <defaults>
</compile_context>

<pallas_src>
import math

import jax
import jax.numpy as jnp
from jax.experimental import pallas as pl
from jax.experimental.pallas import tpu as pltpu


def _round_up(x, m):
    return ((x + m - 1) // m) * m


def _fold_factor(D):
    """Smallest k such that k*D is a multiple of 128 (k=1 if D already is)."""
    if D % 128 == 0:
        return 1
    return 128 // math.gcd(D, 128)


def _vmem_limit_bytes():
    """Generation-aware scoped-VMEM budget (3/4 of physical, capped)."""
    try:
        cap = pltpu.get_tpu_info().vmem_capacity_bytes
    except Exception:
        cap = 64 << 20          # v7x has the smallest VMEM; be conservative
    return min(int(cap) * 3 // 4, 96 << 20)


def aggregate_kernel(va_ref, vb_ref,
                     w1_ref, b1_ref,
                     w2_ref, b2_ref,
                     w3_ref, b3_ref,
                     out_ref,
                     sa_acc, sb_acc):
    s = pl.program_id(1)                      # folded-seq (reduction) axis, last in grid

    # --- init accumulators on the first seq tile ---
    @pl.when(s == 0)
    def _():
        sa_acc[...] = jnp.zeros_like(sa_acc)
        sb_acc[...] = jnp.zeros_like(sb_acc)

    # --- accumulate lane-dense folded partial sums; f32 accumulation regardless
    #     of the streamed dtype (bf16 inputs halve HBM traffic, math stays f32) ---
    sa_acc[...] += jnp.sum(va_ref[...].astype(jnp.float32), axis=1)   # [TB, KD]
    sb_acc[...] += jnp.sum(vb_ref[...].astype(jnp.float32), axis=1)   # [TB, KD]

    # --- on the last seq tile: MLP head (DMA of V_A/V_B overlaps the reduce;
    #     the matmuls run once per batch tile) ---
    @pl.when(s == pl.num_programs(1) - 1)
    def _():
        KD = sa_acc.shape[1]
        # cat([sa, sb], 1) @ W1  ==  sa_fold @ W1a_tiled + sb_fold @ W1b_tiled
        # (the fold over k seq-groups is absorbed into the K = KD contraction).
        h1 = jnp.dot(sa_acc[...], w1_ref[:KD, :],
                     preferred_element_type=jnp.float32)
        h1 = h1 + jnp.dot(sb_acc[...], w1_ref[KD:, :],
                          preferred_element_type=jnp.float32)
        h1 = jnp.maximum(h1 + b1_ref[...], 0.0)          # ReLU (Flatten no-op on 2D)

        h2 = jnp.dot(h1, w2_ref[...], preferred_element_type=jnp.float32)
        h2 = jnp.maximum(h2 + b2_ref[...], 0.0)

        y = jnp.dot(h2, w3_ref[...], preferred_element_type=jnp.float32)
        out_ref[...] = (y + b3_ref[...]).astype(out_ref.dtype)


def prepare_params(params, D):
    """One-time weight prep (outside the hot path):
      * transpose torch [out, in] weights to [in, out],
      * tile W1's V_A/V_B row blocks `fold` times so the lane-dense seq fold is
        absorbed by the first matmul,
      * zero-pad feature dims to multiples of 128 (exact: ReLU(0)=0 and zero
        rows/cols contribute nothing)."""
    H = params["b1"].shape[0]
    O = params["b3"].shape[0]
    k = _fold_factor(D)
    KD = k * D
    Hp = _round_up(H, 128)
    Op = _round_up(O, 128)
    f32 = jnp.float32

    w1t = params["w1"].T.astype(f32)                       # [2D, H]
    w1a = jnp.tile(w1t[:D, :], (k, 1))                     # [KD, H]
    w1b = jnp.tile(w1t[D:, :], (k, 1))                     # [KD, H]
    w1 = jnp.zeros((2 * KD, Hp), f32)
    w1 = w1.at[:KD, :H].set(w1a).at[KD:, :H].set(w1b)
    b1 = jnp.zeros((1, Hp), f32).at[0, :H].set(params["b1"].astype(f32))
    w2 = jnp.zeros((Hp, Hp), f32).at[:H, :H].set(params["w2"].T.astype(f32))
    b2 = jnp.zeros((1, Hp), f32).at[0, :H].set(params["b2"].astype(f32))
    w3 = jnp.zeros((Hp, Op), f32).at[:H, :O].set(params["w3"].T.astype(f32))
    b3 = jnp.zeros((1, Op), f32).at[0, :O].set(params["b3"].astype(f32))
    return {"w1": w1, "b1": b1, "w2": w2, "b2": b2, "w3": w3, "b3": b3,
            "num_outputs": O, "fold": k, "feat": D}


def aggregate_forward(V_A, V_B, prepped, *, batch_tile=None, seq_tile=None,
                      stream_dtype=None):
    """Forward pass of Aggregate.

    batch_tile : rows per batch tile (multiple of 8).  Default: large enough to
                 fill the MXU M dim and amortize per-step overhead, while
                 keeping >=2 batch tiles for big B so v7x's two TCs share work.
    seq_tile   : rows per tile of the *folded* sequence axis (multiple of 8).
                 Default: sized from a chip-specific VMEM budget so each
                 streamed V_A+V_B step is multiple MiB.
    stream_dtype : dtype V_A/V_B are streamed in (default: their own dtype).
                 Passing/holding bf16 inputs halves HBM traffic of this
                 memory-bound reduce; accumulation is always f32."""
    B, S, D = V_A.shape
    assert V_B.shape == (B, S, D)
    assert D == prepped["feat"], "prepare_params was built for a different D"
    k = prepped["fold"]
    KD = k * D
    Hp = prepped["b1"].shape[1]
    Op = prepped["b3"].shape[1]
    O = prepped["num_outputs"]

    stream_dtype = jnp.dtype(stream_dtype if stream_dtype is not None else V_A.dtype)
    itemsize = stream_dtype.itemsize

    # ---- batch tile ---------------------------------------------------------
    if batch_tile is None:
        if B <= 128:
            batch_tile = _round_up(max(B, 8), 8)     # whole batch in one tile
        elif B <= 512:
            batch_tile = 128                         # >=2 tiles -> both v7x TCs busy
        else:
            batch_tile = 256
    TB = batch_tile
    assert TB % 8 == 0, "batch_tile must be a multiple of 8"
    B_pad = _round_up(B, TB)

    vmem_limit = _vmem_limit_bytes()

    # ---- folded-seq tile: target multi-MiB streamed blocks per grid step ----
    Sf_raw = pl.cdiv(S, k)
    # double-buffered constant blocks + output buffers + accumulators
    const_bytes = 2 * 4 * (2 * KD * Hp + Hp + Hp * Hp + Hp + Hp * Op + Op)
    other_bytes = const_bytes + 2 * TB * Op * 4 + 2 * TB * KD * 4
    stream_allowance = max(vmem_limit - other_bytes, 1 << 20)
    per_step_target = min(stream_allowance // 2, 8 << 20)   # //2: double buffering
    if seq_tile is None:
        tsf = per_step_target // (2 * TB * KD * itemsize)    # 2 streamed arrays
        tsf = max(8, (tsf // 8) * 8)
        seq_tile = min(tsf, _round_up(Sf_raw, 8))
    TSf = seq_tile
    assert TSf % 8 == 0, "seq_tile must be a multiple of 8"
    Sf_pad = _round_up(Sf_raw, TSf)
    S_pad = Sf_pad * k

    # ---- wrapper-side zero padding (exact for a sum) + lane-dense fold ------
    def prep_input(v):
        v = v.astype(stream_dtype)
        if B_pad != B or S_pad != S:
            v = jnp.pad(v, ((0, B_pad - B), (0, S_pad - S), (0, 0)))
        return v.reshape(B_pad, Sf_pad, KD)

    va = prep_input(V_A)
    vb = prep_input(V_B)

    grid = (B_pad // TB, Sf_pad // TSf)
    const = lambda shape: pl.BlockSpec(shape, lambda b, s: (0,) * len(shape))

    out_padded = pl.pallas_call(
        aggregate_kernel,
        out_shape=jax.ShapeDtypeStruct((B_pad, Op), jnp.float32),
        grid=grid,
        in_specs=[
            pl.BlockSpec((TB, TSf, KD), lambda b, s: (b, s, 0)),   # V_A (folded)
            pl.BlockSpec((TB, TSf, KD), lambda b, s: (b, s, 0)),   # V_B (folded)
            const((2 * KD, Hp)),                                   # W1 (tiled+padded, [in,out])
            const((1, Hp)),                                        # b1
            const((Hp, Hp)),                                       # W2
            const((1, Hp)),                                        # b2
            const((Hp, Op)),                                       # W3
            const((1, Op)),                                        # b3
        ],
        out_specs=pl.BlockSpec((TB, Op), lambda b, s: (b, 0)),     # resident over seq axis
        scratch_shapes=[
            pltpu.VMEM((TB, KD), jnp.float32),                     # folded sum(V_A)
            pltpu.VMEM((TB, KD), jnp.float32),                     # folded sum(V_B)
        ],
        compiler_params=pltpu.CompilerParams(
            dimension_semantics=("parallel", "arbitrary"),
            vmem_limit_bytes=vmem_limit),
    )(va, vb,
      prepped["w1"], prepped["b1"],
      prepped["w2"], prepped["b2"],
      prepped["w3"], prepped["b3"])

    return out_padded[:B, :O]


def reference_forward(V_A, V_B, params):
    sa = V_A.sum(axis=1)
    sb = V_B.sum(axis=1)
    x = jnp.concatenate([sa, sb], axis=1)
    h1 = jax.nn.relu(x @ params["w1"].T + params["b1"])
    h2 = jax.nn.relu(h1 @ params["w2"].T + params["b2"])
    return h2 @ params["w3"].T + params["b3"]


if __name__ == "__main__":
    # Small shapes consistent with the module:
    #   V_A, V_B: [B, S, D]; cat of seq-sums -> [B, 2D] = num_inputs;
    #   the module's mlp requires num_hiddens == num_inputs, so H = 2D.
    # B=3 / S=250 deliberately exercise the wrapper-side zero-padding paths.
    B, S, D = 3, 250, 16
    num_inputs = 2 * D           # 32
    num_hiddens = num_inputs     # 32
    num_outputs = 4

    key = jax.random.PRNGKey(0)
    kva, kvb, k1, k2, k3, kb1, kb2, kb3 = jax.random.split(key, 8)

    V_A = jax.random.normal(kva, (B, S, D), dtype=jnp.float32)
    V_B = jax.random.normal(kvb, (B, S, D), dtype=jnp.float32)

    params = {
        "w1": 0.1 * jax.random.normal(k1, (num_hiddens, num_inputs), jnp.float32),
        "b1": 0.1 * jax.random.normal(kb1, (num_hiddens,), jnp.float32),
        "w2": 0.1 * jax.random.normal(k2, (num_hiddens, num_inputs), jnp.float32),
        "b2": 0.1 * jax.random.normal(kb2, (num_hiddens,), jnp.float32),
        "w3": 0.1 * jax.random.normal(k3, (num_outputs, num_hiddens), jnp.float32),
        "b3": 0.1 * jax.random.normal(kb3, (num_outputs,), jnp.float32),
    }

    # One-time weight prep (transpose + W1 fold-tiling + lane-dense padding).
    prepped = prepare_params(params, D)
    y_ref = reference_forward(V_A, V_B, params)

    # 1) f32 streaming; seq_tile=8 forces several reduction steps so the
    #    VMEM-resident accumulator path is exercised (folded seq length is 32).
    y = aggregate_forward(V_A, V_B, prepped, seq_tile=8)
    jax.block_until_ready(y)
    assert y.shape == (B, num_outputs)
    assert jnp.allclose(y, y_ref, atol=1e-3, rtol=1e-3), "f32 path mismatch vs reference"

    # 2) bf16 input streaming (halves HBM traffic of the mem-bound reduce);
    #    accumulation stays f32, so only input-rounding error remains.
    y_bf16 = aggregate_forward(V_A.astype(jnp.bfloat16), V_B.astype(jnp.bfloat16),
                               prepped)
    jax.block_until_ready(y_bf16)
    assert y_bf16.shape == (B, num_outputs)
    assert jnp.allclose(y_bf16, y_ref, atol=0.2, rtol=0.05), "bf16 path mismatch vs reference"

    print("KERNEL_OK")
</pallas_src>

<mosaic_0001>
module attributes {stable_mosaic.version = 11 : i64} {
  func.func @aggregate_kernel(%arg0: i32, %arg1: i32, %arg2: memref<8x8x128xf32, #tpu.memory_space<vmem>>, %arg3: memref<8x8x128xf32, #tpu.memory_space<vmem>>, %arg4: memref<256x128xf32, #tpu.memory_space<vmem>>, %arg5: memref<1x128xf32, #tpu.memory_space<vmem>>, %arg6: memref<128x128xf32, #tpu.memory_space<vmem>>, %arg7: memref<1x128xf32, #tpu.memory_space<vmem>>, %arg8: memref<128x128xf32, #tpu.memory_space<vmem>>, %arg9: memref<1x128xf32, #tpu.memory_space<vmem>>, %arg10: memref<8x128xf32, #tpu.memory_space<vmem>>, %arg11: memref<8x128xf32, #tpu.memory_space<vmem>>, %arg12: memref<8x128xf32, #tpu.memory_space<vmem>>) attributes {dimension_semantics = [#tpu.dimension_semantics<parallel>, #tpu.dimension_semantics<arbitrary>], iteration_bounds = array<i64: 1, 4>, scalar_prefetch = 0 : i64, scratch_operands = 2 : i64, tpu.core_type = #tpu.core_type<tc>, window_params = [{transform_indices = @transform_0, window_bounds = array<i64: 8, 8, 128>}, {transform_indices = @transform_1, window_bounds = array<i64: 8, 8, 128>}, {pipeline_mode = #tpu.pipeline_mode<synchronous>, transform_indices = @transform_2, window_bounds = array<i64: 256, 128>}, {pipeline_mode = #tpu.pipeline_mode<synchronous>, transform_indices = @transform_3, window_bounds = array<i64: 1, 128>}, {pipeline_mode = #tpu.pipeline_mode<synchronous>, transform_indices = @transform_4, window_bounds = array<i64: 128, 128>}, {pipeline_mode = #tpu.pipeline_mode<synchronous>, transform_indices = @transform_5, window_bounds = array<i64: 1, 128>}, {pipeline_mode = #tpu.pipeline_mode<synchronous>, transform_indices = @transform_6, window_bounds = array<i64: 128, 128>}, {pipeline_mode = #tpu.pipeline_mode<synchronous>, transform_indices = @transform_7, window_bounds = array<i64: 1, 128>}, {transform_indices = @transform_8, window_bounds = array<i64: 8, 128>}]} {
    %c0_i32 = arith.constant 0 : i32
    %0 = arith.cmpi eq, %arg1, %c0_i32 : i32
    %1 = arith.extui %0 : i1 to i32
    %c0_i32_0 = arith.constant 0 : i32
    %2 = arith.cmpi ne, %1, %c0_i32_0 : i32
    scf.if %2 {
      %cst_16 = arith.constant 0.000000e+00 : f32
      %16 = vector.broadcast %cst_16 : f32 to vector<8x128xf32>
      %c0_17 = arith.constant 0 : index
      %c0_18 = arith.constant 0 : index
      %17 = vector.load %arg11[%c0_17, %c0_18] : memref<8x128xf32, #tpu.memory_space<vmem>>, vector<8x128xf32>
      tpu.vector_store %arg11[%c0_17, %c0_18], %16 {strides = array<i32>} : memref<8x128xf32, #tpu.memory_space<vmem>>, vector<8x128xf32>,
      %cst_19 = arith.constant 0.000000e+00 : f32
      %18 = vector.broadcast %cst_19 : f32 to vector<8x128xf32>
      %c0_20 = arith.constant 0 : index
      %c0_21 = arith.constant 0 : index
      %19 = vector.load %arg12[%c0_20, %c0_21] : memref<8x128xf32, #tpu.memory_space<vmem>>, vector<8x128xf32>
      tpu.vector_store %arg12[%c0_20, %c0_21], %18 {strides = array<i32>} : memref<8x128xf32, #tpu.memory_space<vmem>>, vector<8x128xf32>,
    } else {
    }
    %c0 = arith.constant 0 : index
    %c0_1 = arith.constant 0 : index
    %3 = vector.load %arg11[%c0, %c0_1] : memref<8x128xf32, #tpu.memory_space<vmem>>, vector<8x128xf32>
    %c0_2 = arith.constant 0 : index
    %c0_3 = arith.constant 0 : index
    %c0_4 = arith.constant 0 : index
    %4 = vector.load %arg2[%c0_2, %c0_3, %c0_4] : memref<8x8x128xf32, #tpu.memory_space<vmem>>, vector<8x8x128xf32>
    %cst = arith.constant dense<0.000000e+00> : vector<8x128xf32>
    %5 = vector.multi_reduction <add>, %4, %cst [1] : vector<8x8x128xf32> to vector<8x128xf32>
    %6 = arith.addf %3, %5 : vector<8x128xf32>
    %c0_5 = arith.constant 0 : index
    %c0_6 = arith.constant 0 : index
    %7 = vector.load %arg11[%c0_5, %c0_6] : memref<8x128xf32, #tpu.memory_space<vmem>>, vector<8x128xf32>
    tpu.vector_store %arg11[%c0_5, %c0_6], %6 {strides = array<i32>} : memref<8x128xf32, #tpu.memory_space<vmem>>, vector<8x128xf32>,
    %c0_7 = arith.constant 0 : index
    %c0_8 = arith.constant 0 : index
    %8 = vector.load %arg12[%c0_7, %c0_8] : memref<8x128xf32, #tpu.memory_space<vmem>>, vector<8x128xf32>
    %c0_9 = arith.constant 0 : index
    %c0_10 = arith.constant 0 : index
    %c0_11 = arith.constant 0 : index
    %9 = vector.load %arg3[%c0_9, %c0_10, %c0_11] : memref<8x8x128xf32, #tpu.memory_space<vmem>>, vector<8x8x128xf32>
    %cst_12 = arith.constant dense<0.000000e+00> : vector<8x128xf32>
    %10 = vector.multi_reduction <add>, %9, %cst_12 [1] : vector<8x8x128xf32> to vector<8x128xf32>
    %11 = arith.addf %8, %10 : vector<8x128xf32>
    %c0_13 = arith.constant 0 : index
    %c0_14 = arith.constant 0 : index
    %12 = vector.load %arg12[%c0_13, %c0_14] : memref<8x128xf32, #tpu.memory_space<vmem>>, vector<8x128xf32>
    tpu.vector_store %arg12[%c0_13, %c0_14], %11 {strides = array<i32>} : memref<8x128xf32, #tpu.memory_space<vmem>>, vector<8x128xf32>,
    %c3_i32 = arith.constant 3 : i32
    %13 = arith.cmpi eq, %arg1, %c3_i32 : i32
    %14 = arith.extui %13 : i1 to i32
    %c0_i32_15 = arith.constant 0 : i32
    %15 = arith.cmpi ne, %14, %c0_i32_15 : i32
    scf.if %15 {
      %c0_16 = arith.constant 0 : index
      %c0_17 = arith.constant 0 : index
      %16 = vector.load %arg11[%c0_16, %c0_17] : memref<8x128xf32, #tpu.memory_space<vmem>>, vector<8x128xf32>
      %c0_18 = arith.constant 0 : index
      %c0_19 = arith.constant 0 : index
      %17 = vector.load %arg4[%c0_18, %c0_19] : memref<256x128xf32, #tpu.memory_space<vmem>>, vector<128x128xf32>
      %cst_20 = arith.constant dense<0.000000e+00> : vector<8x128xf32>
      %18 = tpu.matmul %16, %17, %cst_20 {dimension_numbers = #tpu.dot_dimension_numbers<[1], [0], [0], [1], [0, 0, 1, 1], [], []>} : vector<8x128xf32>, vector<128x128xf32>, vector<8x128xf32> -> vector<8x128xf32>
      %c0_21 = arith.constant 0 : index
      %c0_22 = arith.constant 0 : index
      %19 = vector.load %arg12[%c0_21, %c0_22] : memref<8x128xf32, #tpu.memory_space<vmem>>, vector<8x128xf32>
      %c128 = arith.constant 128 : index
      %c0_23 = arith.constant 0 : index
      %20 = vector.load %arg4[%c128, %c0_23] : memref<256x128xf32, #tpu.memory_space<vmem>>, vector<128x128xf32>
      %cst_24 = arith.constant dense<0.000000e+00> : vector<8x128xf32>
      %21 = tpu.matmul %19, %20, %cst_24 {dimension_numbers = #tpu.dot_dimension_numbers<[1], [0], [0], [1], [0, 0, 1, 1], [], []>} : vector<8x128xf32>, vector<128x128xf32>, vector<8x128xf32> -> vector<8x128xf32>
      %22 = arith.addf %18, %21 : vector<8x128xf32>
      %c0_25 = arith.constant 0 : index
      %c0_26 = arith.constant 0 : index
      %23 = vector.load %arg5[%c0_25, %c0_26] : memref<1x128xf32, #tpu.memory_space<vmem>>, vector<1x128xf32>
      %24 = vector.broadcast %23 : vector<1x128xf32> to vector<8x128xf32>
      %25 = arith.addf %22, %24 : vector<8x128xf32>
      %cst_27 = arith.constant 0.000000e+00 : f32
      %26 = vector.broadcast %cst_27 : f32 to vector<8x128xf32>
      %27 = arith.maximumf %25, %26 : vector<8x128xf32>
      %c0_28 = arith.constant 0 : index
      %c0_29 = arith.constant 0 : index
      %28 = vector.load %arg6[%c0_28, %c0_29] : memref<128x128xf32, #tpu.memory_space<vmem>>, vector<128x128xf32>
      %cst_30 = arith.constant dense<0.000000e+00> : vector<8x128xf32>
      %29 = tpu.matmul %27, %28, %cst_30 {dimension_numbers = #tpu.dot_dimension_numbers<[1], [0], [0], [1], [0, 0, 1, 1], [], []>} : vector<8x128xf32>, vector<128x128xf32>, vector<8x128xf32> -> vector<8x128xf32>
      %c0_31 = arith.constant 0 : index
      %c0_32 = arith.constant 0 : index
      %30 = vector.load %arg7[%c0_31, %c0_32] : memref<1x128xf32, #tpu.memory_space<vmem>>, vector<1x128xf32>
      %31 = vector.broadcast %30 : vector<1x128xf32> to vector<8x128xf32>
      %32 = arith.addf %29, %31 : vector<8x128xf32>
      %cst_33 = arith.constant 0.000000e+00 : f32
      %33 = vector.broadcast %cst_33 : f32 to vector<8x128xf32>
      %34 = arith.maximumf %32, %33 : vector<8x128xf32>
      %c0_34 = arith.constant 0 : index
      %c0_35 = arith.constant 0 : index
      %35 = vector.load %arg8[%c0_34, %c0_35] : memref<128x128xf32, #tpu.memory_space<vmem>>, vector<128x128xf32>
      %cst_36 = arith.constant dense<0.000000e+00> : vector<8x128xf32>
      %36 = tpu.matmul %34, %35, %cst_36 {dimension_numbers = #tpu.dot_dimension_numbers<[1], [0], [0], [1], [0, 0, 1, 1], [], []>} : vector<8x128xf32>, vector<128x128xf32>, vector<8x128xf32> -> vector<8x128xf32>
      %c0_37 = arith.constant 0 : index
      %c0_38 = arith.constant 0 : index
      %37 = vector.load %arg9[%c0_37, %c0_38] : memref<1x128xf32, #tpu.memory_space<vmem>>, vector<1x128xf32>
      %38 = vector.broadcast %37 : vector<1x128xf32> to vector<8x128xf32>
      %39 = arith.addf %36, %38 : vector<8x128xf32>
      %c0_39 = arith.constant 0 : index
      %c0_40 = arith.constant 0 : index
      %40 = vector.load %arg10[%c0_39, %c0_40] : memref<8x128xf32, #tpu.memory_space<vmem>>, vector<8x128xf32>
      tpu.vector_store %arg10[%c0_39, %c0_40], %39 {strides = array<i32>} : memref<8x128xf32, #tpu.memory_space<vmem>>, vector<8x128xf32>,
    } else {
    }
    return
  }
  func.func @transform_0(%arg0: i32, %arg1: i32) -> (i32, i32, i32) {
    %c0_i32 = arith.constant 0 : i32
    %c0_i32_0 = arith.constant 0 : i32
    return %arg0, %arg1, %c0_i32 : i32, i32, i32
  }
  func.func @transform_1(%arg0: i32, %arg1: i32) -> (i32, i32, i32) {
    %c0_i32 = arith.constant 0 : i32
    %c0_i32_0 = arith.constant 0 : i32
    return %arg0, %arg1, %c0_i32 : i32, i32, i32
  }
  func.func @transform_2(%arg0: i32, %arg1: i32) -> (i32, i32) {
    %c0_i32 = arith.constant 0 : i32
    %c0_i32_0 = arith.constant 0 : i32
    %c0_i32_1 = arith.constant 0 : i32
    return %c0_i32, %c0_i32_0 : i32, i32
  }
  func.func @transform_3(%arg0: i32, %arg1: i32) -> (i32, i32) {
    %c0_i32 = arith.constant 0 : i32
    %c0_i32_0 = arith.constant 0 : i32
    %c0_i32_1 = arith.constant 0 : i32
    return %c0_i32, %c0_i32_0 : i32, i32
  }
  func.func @transform_4(%arg0: i32, %arg1: i32) -> (i32, i32) {
    %c0_i32 = arith.constant 0 : i32
    %c0_i32_0 = arith.constant 0 : i32
    %c0_i32_1 = arith.constant 0 : i32
    return %c0_i32, %c0_i32_0 : i32, i32
  }
  func.func @transform_5(%arg0: i32, %arg1: i32) -> (i32, i32) {
    %c0_i32 = arith.constant 0 : i32
    %c0_i32_0 = arith.constant 0 : i32
    %c0_i32_1 = arith.constant 0 : i32
    return %c0_i32, %c0_i32_0 : i32, i32
  }
  func.func @transform_6(%arg0: i32, %arg1: i32) -> (i32, i32) {
    %c0_i32 = arith.constant 0 : i32
    %c0_i32_0 = arith.constant 0 : i32
    %c0_i32_1 = arith.constant 0 : i32
    return %c0_i32, %c0_i32_0 : i32, i32
  }
  func.func @transform_7(%arg0: i32, %arg1: i32) -> (i32, i32) {
    %c0_i32 = arith.constant 0 : i32
    %c0_i32_0 = arith.constant 0 : i32
    %c0_i32_1 = arith.constant 0 : i32
    return %c0_i32, %c0_i32_0 : i32, i32
  }
  func.func @transform_8(%arg0: i32, %arg1: i32) -> (i32, i32) {
    %c0_i32 = arith.constant 0 : i32
    %c0_i32_0 = arith.constant 0 : i32
    return %arg0, %c0_i32 : i32, i32
  }
}

</mosaic_0001>

<bundles_post_ra>
// kernel: tpu_custom_call.1
= control target key start
LH: loop header
LB: loop body
LE: loop exit
PB: predicated region body
PF: predicated region fallthrough
CT: control target
= control target key end

     0   :  { %s1502_s0 = inlined_call_operand.hbm [shape: f32[8,32,128], index: 0, kind: input, shape index: {}]   ;;  %s1503_s1 = inlined_call_operand.hbm [shape: f32[8,32,128], index: 1, kind: input, shape index: {}]   ;;  %s1504_s2 = inlined_call_operand.hbm [shape: f32[256,128], index: 2, kind: input, shape index: {}]   ;;  %s1505_s3 = inlined_call_operand.vmem [shape: f32[1,128], index: 3, kind: input, shape index: {}]   ;;  %s1506_s4 = inlined_call_operand.hbm [shape: f32[128,128], index: 4, kind: input, shape index: {}]   ;;  %s1507_s5 = inlined_call_operand.vmem [shape: f32[1,128], index: 5, kind: input, shape index: {}]   ;;  %s1508_s6 = inlined_call_operand.hbm [shape: f32[128,128], index: 6, kind: input, shape index: {}]   ;;  %s1509_s7 = inlined_call_operand.vmem [shape: f32[1,128], index: 7, kind: input, shape index: {}]   ;;  %s1510_s8 = inlined_call_operand.hbm [shape: f32[8,128], index: 8, kind: output, shape index: {}]  }
   0x1   :  { %1517 = sst [smem:[#allocation22_spill]] %s1504_s2 }
   0x2   :  { %1518 = sst [smem:[#allocation23_spill]] %s1506_s4 }
   0x3   :  { %1519 = sst [smem:[#allocation24_spill]] %s1508_s6 }
   0x4   :  { %13 = vsyncpa [#allocation5], 0 }
   0x5   :  { %15 = vsyncpa [#allocation5 + $0x1], 0 }
   0x6   :  { %16 = vsyncpa [#allocation8], 0 }
   0x7   :  { %18 = vsyncpa [#allocation8 + $0x1], 0 }
   0x8   :  { %19 = vsyncpa [#allocation11], 0 }
   0x9   :  { %20 = vsyncpa [#allocation6], 0  ;;  %s1314_s27 = smov 0   ;;  %s1316_s28 = smov 0  }
   0xa   :  { %s1318_s29 = smov 0   ;;  %s1320_s30 = smov 0  }
   0xb   :  { %s1322_s9 = smov 0   ;;  %s1324_s10 = smov 0  }
   0xc LB: > { %1520 = sst [smem:[#allocation19_spill]] %s1255_s9  ;;  %s1343_s11 = sadd.s32 4294967295, %s1259_s10   ;;  %s1259_s10 = sphi %s1324_s10, %s26_s10   ;;  %s1255_s9 = sphi %s1322_s9, %s1534_s9   ;;  %s1251_s30 = sphi %s1320_s30, %s1533_s30   ;;  %s1247_s29 = sphi %s1318_s29, %s1537_s29   ;;  %s1243_s28 = sphi %s1316_s28, %s1536_s28   ;;  %s1239_s27 = sphi %s1314_s27, %s1535_s27  }
   0xd   : > { %p60_p0 = scmp.ne.s32.totalorder %s1243_s28, %s1239_s27  ;;  %p61_p1 = scmp.eq.s32.totalorder %s1343_s11, 0 }
   0xe   : > { %p889_p2 = scmp.ge.s32.totalorder %s1259_s10, 1  ;;  %p251_p3 = scmp.lt.s32.totalorder %s1259_s10, 5 }
   0xf   : > { %p1351_p4 = por %p61_p1, %p60_p0  ;;  %s1522_s2 = sld [smem:[#allocation22_spill]] }
  0x10   : > { %p1358_p5 = pnand %p889_p2, %p251_p3  ;;  %s1261_s17 = smov [#allocation9]  }
  0x11   : > { %s264_s18 = sshll.u32 %s1261_s17, 4  ;;  %s1525_s4 = sld [smem:[#allocation23_spill]]  ;;  %s265_s18 = int_to_ptr.vmem [resolvable:$true] %s264_s18 }
  0x12   : > { %p930_p6 = pneg %p1358_p5  ;;  %s1511_s23 = smov 128  }
  0x13   : > { %s1513_s24 = smov 8   ;;  %s1264_s25 = smov [#allocation10]  }
  0x14   : > { %p1366_p7 = pnand %p930_p6, %p61_p1  ;;  %s281_s26 = sshll.u32 %s1264_s25, 4  ;;  %s282_s26 = int_to_ptr.vmem [resolvable:$true] %s281_s26 }
  0x15   : > { %s262_s15 = sshll.u32 %s1522_s2, 4  ;;  %s1526_s6 = sld [smem:[#allocation24_spill]]  ;;  %s263_s15 = int_to_ptr.hbm [resolvable:$true] %s262_s15 }
  0x16   : > { %933 = dma.hbm_to_vmem [thread:$0]  (!%p1366_p7), %s263_s15, 4096, %s265_s18, [#allocation8], %s1511_s23, %s1511_s23, %s1513_s24  }
  0x17   : > { %s279_s22 = sshll.u32 %s1525_s4, 4  ;;  %s1265_s17 = smov [#allocation12]   ;;  %s280_s22 = int_to_ptr.hbm [resolvable:$true] %s279_s22 }
  0x18   : > { %936 = dma.hbm_to_vmem [thread:$0]  (!%p1366_p7), %s280_s22, 2048, %s282_s26, [#allocation11], %s1511_s23, %s1511_s23, %s1513_s24  }
  0x19   : > { %s298_s20 = sshll.u32 %s1265_s17, 4  ;;  %s35_s15 = sadd.s32 1, %s1255_s9  ;;  %s299_s20 = int_to_ptr.vmem [resolvable:$true] %s298_s20 }
  0x1a   : > { %p36_p8 = scmp.ge.s32.totalorder %s35_s15, 4  ;;  %s47_s18 = sadd.s32 1, %s1247_s29 }
  0x1b   : > { %s296_s14 = sshll.u32 %s1526_s6, 4  ;;  %p54_p9 = scmp.ne.s32.totalorder %s1247_s29, %s1243_s28  ;;  %s297_s14 = int_to_ptr.hbm [resolvable:$true] %s296_s14 }
  0x1c   : > { %939 = dma.hbm_to_vmem [thread:$0]  (!%p1366_p7), %s297_s14, 2048, %s299_s20, [#allocation11], %s1511_s23, %s1511_s23, %s1513_s24  }
  0x1d   : > { %p55_p10 = scmp.eq.s32.totalorder %s1259_s10, 0  ;;  %s1539_s15 = smov (%p36_p8, %s35_s15), 0 }
  0x1e   : > { %1527 = sst [smem:[#allocation20_spill]] %s1539_s15  ;;  %p950_p12 = scmp.lt.s32.totalorder %s1259_s10, 4 }
  0x1f   : > { %p1398_p11 = por %p55_p10, %p54_p9  ;;  %s43_s19 = ssub.s32 %s1255_s9, %s1539_s15 }
  0x20   : > { %s315_s22 = sand.u32 1, %s1247_s29   ;;  %p45_p13 = scmp.eq.s32.totalorder %s43_s19, 0 }
  0x21   : > { %s894_s25 = sshll.u32 %s315_s22, 6  ;;  %s895_s26 = sshll.u32 %s1255_s9, 3 }
  0x22   : > { %s1408_s27 = scalar_select %p45_p13, %s1247_s29, %s47_s18  }
  0x23   : > { %s326_s17 = scalar_lea.hbm %s1502_s0, %s895_s26  ;;  %s319_s23 = scalar_lea.vmem [#allocation4], %s894_s25 }
  0x24   : > { %1529 = sst [smem:[#allocation21_spill]] %s1408_s27  ;;  %s327_s20 = sshll.u32 %s326_s17, 4  ;;  %s328_s20 = int_to_ptr.hbm [resolvable:$true] %s327_s20 }
  0x25   : > { %s329_s24 = sshll.u32 %s319_s23, 4  ;;  %p941_p0 = pnand %p950_p12, %p1398_p11  ;;  %s330_s24 = int_to_ptr.vmem [resolvable:$true] %s329_s24 }
  0x26   : > { %s350_s19 = scalar_lea.hbm %s1503_s1, %s895_s26  ;;  %s316_s18 = scalar_lea.sflag [#allocation5], %s315_s22 }
  0x27   : > { %s351_s6 = sshll.u32 %s350_s19, 4  ;;  %s1266_s15 = smov 512   ;;  %s352_s6 = int_to_ptr.hbm [resolvable:$true] %s351_s6 }
  0x28   : > { %s1530_s9 = smov 8   ;;  %s1531_s27 = smov 128  }
  0x29   : > { %943 = dma.hbm_to_vmem [thread:$0]  (!%p941_p0), %s328_s20, 1024, %s330_s24, %s316_s18, %s1266_s15, %s1531_s27, %s1530_s9  }
  0x2a   : > { %s343_s13 = scalar_lea.vmem [#allocation7], %s894_s25  ;;  %s339_s23 = sand.u32 1, %s1259_s10  }
  0x2b   : > { %s353_s14 = sshll.u32 %s343_s13, 4  ;;  %s340_s17 = scalar_lea.sflag [#allocation8], %s339_s23  ;;  %s354_s14 = int_to_ptr.vmem [resolvable:$true] %s353_s14 }
  0x2c   : > { %946 = dma.hbm_to_vmem [thread:$0]  (!%p941_p0), %s352_s6, 1024, %s354_s14, %s340_s17, %s1266_s15, %s1531_s27, %s1530_s9  }
  0x2d   : > { %365 = sbr.rel (%p1358_p5) target bundleno = 548 (0x224), region = 52  ;;  %s367_s2 = sand.u32 (!%p1358_p5), 1, %s1243_s28  }
  0x2e   : > { %s899_s4 = sshll.u32 (!%p1358_p5), %s367_s2, 6  ;;  %s368_s21 = scalar_lea.sflag (!%p1358_p5), [#allocation5], %s367_s2 }
  0x2f   : > { %s371_s22 = scalar_lea.vmem (!%p1358_p5), [#allocation4], %s899_s4 }
  0x32   : > { %1218 = dma.done.wait (%p1351_p4), %s368_s21, 1024  }
  0x33   : > { %1220 = vsyncadd (%p1351_p4), %s368_s21, 4294966272  ;;  %s377_s24 = sand.u32 1, %s1343_s11   ;;  %s1433_s26 = scalar_lea.vmem [#allocation7], %s899_s4 }
  0x34   : > { %s378_s25 = scalar_lea.sflag [#allocation8], %s377_s24 }
  0x35   : > { %1222 = dma.done.wait (%p1351_p4), %s378_s25, 1024  }
  0x36   : > { %1224 = vsyncadd (%p1351_p4), %s378_s25, 4294966272 }
  0x37   : > { %1226 = dma.done.wait (%p61_p1), [#allocation8], 4096  }
  0x38   : > { %1228 = vsyncadd (%p61_p1), [#allocation8], 4294963200 }
  0x39   : > { %1230 = dma.done.wait (%p61_p1), [#allocation11], 4096  }
  0x3a   : > { %1232 = vsyncadd (%p61_p1), [#allocation11], 4294963200  ;;  %p904_p2 = scmp.ne.s32.totalorder %s1251_s30, 0 }
  0x3c   : > { %435 = sbr.rel (%p904_p2) target bundleno = 68 (0x44), region = 76 }
  0x41   : > { %v1267_v0 = vmov 0.0  }
  0x42   : > { %436 = vst [vmem:[#allocation2] sm:$0xff] %v1267_v0 }
  0x43   : > { %437 = vst [vmem:[#allocation3] sm:$0xff] %v1267_v0 }
  0x44 PF: > { %v439_v1 = vld [vmem:[%s371_s22] sm:$0xff]  ;;  %v440_v2 = vld [vmem:[%s371_s22 + $0x8] sm:$0xff]  ;;  %v441_v3 = vld [vmem:[%s371_s22 + $0x10] sm:$0xff]  ;;  %vm503_vm0 = vcmask 1041409   ;;  %vm505_vm1 = vcmask 1042434   ;;  %vm507_vm2 = vcmask 1043459  }
  0x45   : > { %v442_v4 = vld [vmem:[%s371_s22 + $0x18] sm:$0xff]  ;;  %v443_v5 = vld [vmem:[%s371_s22 + $0x20] sm:$0xff]  ;;  %v447_v6 = vrot.slane %v439_v1, 4  ;;  %v453_v7 = vrot.slane %v440_v2, 4  ;;  %v444_v8 = vld [vmem:[%s371_s22 + $0x28] sm:$0xff]  ;;  %v459_v11 = vrot.slane %v441_v3, 4 }
  0x46   : > { %v445_v9 = vld [vmem:[%s371_s22 + $0x30] sm:$0xff]  ;;  %v446_v10 = vld [vmem:[%s371_s22 + $0x38] sm:$0xff]  ;;  %v465_v12 = vrot.slane %v442_v4, 4  ;;  %v471_v13 = vrot.slane %v443_v5, 4  ;;  %v477_v16 = vrot.slane %v444_v8, 4  ;;  %vm509_vm3 = vcmask 1044484  }
  0x47   : > { %v448_v14 = vadd.f32 %v447_v6, %v439_v1  ;;  %v454_v15 = vadd.f32 %v453_v7, %v440_v2  ;;  %v483_v17 = vrot.slane %v445_v9, 4  ;;  %v460_v18 = vadd.f32 %v459_v11, %v441_v3  ;;  %v521_v54 = vld [vmem:[%s1433_s26] sm:$0xff]  ;;  %v522_v55 = vld [vmem:[%s1433_s26 + $0x8] sm:$0xff]  ;;  %v523_v56 = vld [vmem:[%s1433_s26 + $0x10] sm:$0xff]  ;;  %p905_p1 = scmp.ne.s32.totalorder %s1251_s30, 3 }
  0x48   : > { %v466_v19 = vadd.f32 %v465_v12, %v442_v4  ;;  %v472_v20 = vadd.f32 %v471_v13, %v443_v5  ;;  %v489_v21 = vrot.slane %v446_v10, 4  ;;  %v478_v24 = vadd.f32 %v477_v16, %v444_v8  ;;  %v524_v60 = vld [vmem:[%s1433_s26 + $0x18] sm:$0xff]  ;;  %v525_v61 = vld [vmem:[%s1433_s26 + $0x20] sm:$0xff]  ;;  %v526_v62 = vld [vmem:[%s1433_s26 + $0x28] sm:$0xff] }
  0x49   : > { %v449_v22 = vrot.slane %v448_v14, 2  ;;  %v455_v23 = vrot.slane %v454_v15, 2  ;;  %v484_v25 = vadd.f32 %v483_v17, %v445_v9  ;;  %v461_v26 = vrot.slane %v460_v18, 2  ;;  %v438_v9 = vld [vmem:[#allocation2] sm:$0xff] }
  0x4a   : > { %v467_v27 = vrot.slane %v466_v19, 2  ;;  %v473_v28 = vrot.slane %v472_v20, 2  ;;  %v490_v29 = vadd.f32 %v489_v21, %v446_v10  ;;  %v479_v32 = vrot.slane %v478_v24, 2 }
  0x4b   : > { %v450_v30 = vadd.f32 %v449_v22, %v448_v14  ;;  %v456_v31 = vadd.f32 %v455_v23, %v454_v15  ;;  %v485_v33 = vrot.slane %v484_v25, 2  ;;  %v462_v34 = vadd.f32 %v461_v26, %v460_v18  ;;  %v527_v15 = vld [vmem:[%s1433_s26 + $0x30] sm:$0xff] }
  0x4c   : > { %v468_v35 = vadd.f32 %v467_v27, %v466_v19  ;;  %v474_v36 = vadd.f32 %v473_v28, %v472_v20  ;;  %v491_v37 = vrot.slane %v490_v29, 2  ;;  %v480_v40 = vadd.f32 %v479_v32, %v478_v24  ;;  %v528_v20 = vld [vmem:[%s1433_s26 + $0x38] sm:$0xff] }
  0x4d   : > { %v451_v38 = vrot.slane %v450_v30, 1  ;;  %v457_v39 = vrot.slane %v456_v31, 1  ;;  %v486_v41 = vadd.f32 %v485_v33, %v484_v25  ;;  %v463_v42 = vrot.slane %v462_v34, 1 }
  0x4e   : > { %v469_v43 = vrot.slane %v468_v35, 1  ;;  %v475_v44 = vrot.slane %v474_v36, 1  ;;  %v492_v45 = vadd.f32 %v491_v37, %v490_v29  ;;  %v481_v48 = vrot.slane %v480_v40, 1 }
  0x4f   : > { %v452_v46 = vadd.f32 %v451_v38, %v450_v30  ;;  %v458_v47 = vadd.f32 %v457_v39, %v456_v31  ;;  %v487_v49 = vrot.slane %v486_v41, 1  ;;  %v464_v50 = vadd.f32 %v463_v42, %v462_v34 }
  0x50   : > { %v470_v51 = vadd.f32 %v469_v43, %v468_v35  ;;  %v476_v52 = vadd.f32 %v475_v44, %v474_v36  ;;  %v493_v53 = vrot.slane %v492_v45, 1  ;;  %v482_v57 = vadd.f32 %v481_v48, %v480_v40 }
  0x51   : > { %v488_v58 = vadd.f32 %v487_v49, %v486_v41  ;;  %v504_v59 = vsel %vm503_vm0, %v458_v47, %v452_v46  ;;  %vm511_vm4 = vcmask 1045509   ;;  %vm513_vm5 = vcmask 1046534  }
  0x52   : > { %v494_v63 = vadd.f32 %v493_v53, %v492_v45  ;;  %v506_v0 = vsel %vm505_vm1, %v464_v50, %v504_v59  ;;  %vm515_vm6 = vcmask 1047559   ;;  %v529_v2 = vrot.slane %v521_v54, 4 }
  0x53   : > { %v508_v1 = vsel %vm507_vm2, %v470_v51, %v506_v0  ;;  %v535_v3 = vrot.slane %v522_v55, 4  ;;  %v541_v4 = vrot.slane %v523_v56, 4  ;;  %v547_v6 = vrot.slane %v524_v60, 4 }
  0x54   : > { %v510_v5 = vsel %vm509_vm3, %v476_v52, %v508_v1  ;;  %v553_v7 = vrot.slane %v525_v61, 4  ;;  %v559_v8 = vrot.slane %v526_v62, 4  ;;  %v530_v11 = vadd.f32 %v529_v2, %v521_v54 }
  0x55   : > { %v512_v10 = vsel %vm511_vm4, %v482_v57, %v510_v5  ;;  %v536_v12 = vadd.f32 %v535_v3, %v522_v55  ;;  %v542_v13 = vadd.f32 %v541_v4, %v523_v56  ;;  %v548_v16 = vadd.f32 %v547_v6, %v524_v60 }
  0x56   : > { %v514_v14 = vsel %vm513_vm5, %v488_v58, %v512_v10  ;;  %v554_v17 = vadd.f32 %v553_v7, %v525_v61  ;;  %v560_v18 = vadd.f32 %v559_v8, %v526_v62  ;;  %v531_v21 = vrot.slane %v530_v11, 2  ;;  %v520_v62 = vld [vmem:[#allocation3] sm:$0xff] }
  0x57   : > { %v516_v19 = vsel %vm515_vm6, %v494_v63, %v514_v14  ;;  %v537_v22 = vrot.slane %v536_v12, 2  ;;  %v543_v23 = vrot.slane %v542_v13, 2  ;;  %v549_v25 = vrot.slane %v548_v16, 2 }
  0x58   : > { %v518_v24 = vadd.f32 %v516_v19, %v438_v9  ;;  %v555_v26 = vrot.slane %v554_v17, 2  ;;  %v561_v27 = vrot.slane %v560_v18, 2  ;;  %v532_v28 = vadd.f32 %v531_v21, %v530_v11 }
  0x59   : > { %v538_v29 = vadd.f32 %v537_v22, %v536_v12  ;;  %v544_v30 = vadd.f32 %v543_v23, %v542_v13  ;;  %v565_v31 = vrot.slane %v527_v15, 4  ;;  %v550_v32 = vadd.f32 %v549_v25, %v548_v16 }
  0x5a   : > { %519 = vst [vmem:[#allocation2] sm:$0xff] %v518_v24  ;;  %v556_v33 = vadd.f32 %v555_v26, %v554_v17  ;;  %v562_v34 = vadd.f32 %v561_v27, %v560_v18  ;;  %v571_v35 = vrot.slane %v528_v20, 4  ;;  %v533_v36 = vrot.slane %v532_v28, 1 }
  0x5b   : > { %v539_v37 = vrot.slane %v538_v29, 1  ;;  %v545_v38 = vrot.slane %v544_v30, 1  ;;  %v566_v39 = vadd.f32 %v565_v31, %v527_v15  ;;  %v551_v40 = vrot.slane %v550_v32, 1 }
  0x5c   : > { %v557_v41 = vrot.slane %v556_v33, 1  ;;  %v563_v42 = vrot.slane %v562_v34, 1  ;;  %v572_v43 = vadd.f32 %v571_v35, %v528_v20  ;;  %v534_v44 = vadd.f32 %v533_v36, %v532_v28 }
  0x5d   : > { %v540_v45 = vadd.f32 %v539_v37, %v538_v29  ;;  %v546_v46 = vadd.f32 %v545_v38, %v544_v30  ;;  %v567_v47 = vrot.slane %v566_v39, 2  ;;  %v552_v48 = vadd.f32 %v551_v40, %v550_v32 }
  0x5e   : > { %v558_v49 = vadd.f32 %v557_v41, %v556_v33  ;;  %v573_v50 = vrot.slane %v572_v43, 2  ;;  %v564_v51 = vadd.f32 %v563_v42, %v562_v34 }
  0x5f   : > { %v568_v52 = vadd.f32 %v567_v47, %v566_v39  ;;  %v585_v53 = vsel %vm503_vm0, %v540_v45, %v534_v44 }
  0x60   : > { %v574_v54 = vadd.f32 %v573_v50, %v572_v43  ;;  %v586_v55 = vsel %vm505_vm1, %v546_v46, %v585_v53 }
  0x61   : > { %v569_v56 = vrot.slane %v568_v52, 1  ;;  %v587_v57 = vsel %vm507_vm2, %v552_v48, %v586_v55 }
  0x62   : > { %v575_v58 = vrot.slane %v574_v54, 1  ;;  %v588_v59 = vsel %vm509_vm3, %v558_v49, %v587_v57 }
  0x63   : > { %v570_v60 = vadd.f32 %v569_v56, %v568_v52  ;;  %v589_v61 = vsel %vm511_vm4, %v564_v51, %v588_v59 }
  0x64   : > { %v576_v63 = vadd.f32 %v575_v58, %v574_v54 }
  0x65   : > { %v590_v0 = vsel %vm513_vm5, %v570_v60, %v589_v61  ;;  %598 = sbr.rel (%p905_p1) target bundleno = 542 (0x21e), region = 80 }
  0x66   : > { %v591_v1 = vsel %vm515_vm6, %v576_v63, %v590_v0 }
  0x67   : > { %v593_v2 = vadd.f32 %v591_v1, %v520_v62 }
  0x69   : > { %594 = vst [vmem:[#allocation3] sm:$0xff] %v593_v2 }
  0x6a   : > { %v632_v3 = vld [vmem:[#allocation9 + $0xf8] sm:$0xff]  ;;  %v631_v5 = vld [vmem:[#allocation9 + $0xf0] sm:$0xff]  ;;  %v630_v7 = vld [vmem:[#allocation9 + $0xe8] sm:$0xff] }
  0x6b   : > { %v615_v4 = vld [vmem:[#allocation9 + $0x78] sm:$0xff]  ;;  %633 = vmatpush.msra.mxu0 %v632_v3  ;;  %v614_v6 = vld [vmem:[#allocation9 + $0x70] sm:$0xff]  ;;  %v613_v8 = vld [vmem:[#allocation9 + $0x68] sm:$0xff] }
  0x6c   : > { %653 = vmatpush.msra.mxu1 %v615_v4  ;;  %v629_v9 = vld [vmem:[#allocation9 + $0xe0] sm:$0xff]  ;;  %v628_v11 = vld [vmem:[#allocation9 + $0xd8] sm:$0xff]  ;;  %v627_v13 = vld [vmem:[#allocation9 + $0xd0] sm:$0xff] }
  0x6d   : > { %634 = vmatpush.msra.mxu0 %v631_v5  ;;  %v612_v10 = vld [vmem:[#allocation9 + $0x60] sm:$0xff]  ;;  %v611_v12 = vld [vmem:[#allocation9 + $0x58] sm:$0xff]  ;;  %v610_v14 = vld [vmem:[#allocation9 + $0x50] sm:$0xff] }
  0x6e   : > { %654 = vmatpush.msra.mxu1 %v614_v6  ;;  %v626_v15 = vld [vmem:[#allocation9 + $0xc8] sm:$0xff]  ;;  %v694_v17 = vld [vmem:[#allocation10 + $0x78] sm:$0xff]  ;;  %v693_v18 = vld [vmem:[#allocation10 + $0x70] sm:$0xff] }
  0x6f   : > { %635 = vmatpush.msra.mxu0 %v630_v7  ;;  %v609_v16 = vld [vmem:[#allocation9 + $0x48] sm:$0xff]  ;;  %v625_v19 = vld [vmem:[#allocation9 + $0xc0] sm:$0xff]  ;;  %699 = vmatpush.msra.mxu2 %v694_v17  ;;  %v624_v22 = vld [vmem:[#allocation9 + $0xb8] sm:$0xff] }
  0x70   : > { %655 = vmatpush.msra.mxu1 %v613_v8  ;;  %v608_v20 = vld [vmem:[#allocation9 + $0x40] sm:$0xff]  ;;  %v692_v21 = vld [vmem:[#allocation10 + $0x68] sm:$0xff]  ;;  %v607_v23 = vld [vmem:[#allocation9 + $0x38] sm:$0xff] }
  0x71   : > { %636 = vmatpush.msra.mxu0 %v629_v9  ;;  %700 = vmatpush.msra.mxu2 %v693_v18  ;;  %v691_v24 = vld [vmem:[#allocation10 + $0x60] sm:$0xff]  ;;  %v623_v25 = vld [vmem:[#allocation9 + $0xb0] sm:$0xff]  ;;  %v690_v27 = vld [vmem:[#allocation10 + $0x58] sm:$0xff] }
  0x72   : > { %656 = vmatpush.msra.mxu1 %v612_v10  ;;  %v606_v26 = vld [vmem:[#allocation9 + $0x30] sm:$0xff]  ;;  %v622_v28 = vld [vmem:[#allocation9 + $0xa8] sm:$0xff]  ;;  %v621_v31 = vld [vmem:[#allocation9 + $0xa0] sm:$0xff] }
  0x73   : > { %637 = vmatpush.msra.mxu0 %v628_v11  ;;  %701 = vmatpush.msra.mxu2 %v692_v21  ;;  %v605_v29 = vld [vmem:[#allocation9 + $0x28] sm:$0xff]  ;;  %v689_v30 = vld [vmem:[#allocation10 + $0x50] sm:$0xff]  ;;  %v604_v32 = vld [vmem:[#allocation9 + $0x20] sm:$0xff] }
  0x74   : > { %657 = vmatpush.msra.mxu1 %v611_v12  ;;  %v688_v33 = vld [vmem:[#allocation10 + $0x48] sm:$0xff]  ;;  %v620_v34 = vld [vmem:[#allocation9 + $0x98] sm:$0xff]  ;;  %v687_v36 = vld [vmem:[#allocation10 + $0x40] sm:$0xff] }
  0x75   : > { %638 = vmatpush.msra.mxu0 %v627_v13  ;;  %702 = vmatpush.msra.mxu2 %v691_v24  ;;  %v603_v35 = vld [vmem:[#allocation9 + $0x18] sm:$0xff]  ;;  %v619_v37 = vld [vmem:[#allocation9 + $0x90] sm:$0xff]  ;;  %v618_v40 = vld [vmem:[#allocation9 + $0x88] sm:$0xff] }
  0x76   : > { %658 = vmatpush.msra.mxu1 %v610_v14  ;;  %v602_v38 = vld [vmem:[#allocation9 + $0x10] sm:$0xff]  ;;  %v686_v39 = vld [vmem:[#allocation10 + $0x38] sm:$0xff]  ;;  %v601_v41 = vld [vmem:[#allocation9 + $0x8] sm:$0xff] }
  0x77   : > { %639 = vmatpush.msra.mxu0 %v626_v15  ;;  %703 = vmatpush.msra.mxu2 %v690_v27  ;;  %v685_v42 = vld [vmem:[#allocation10 + $0x30] sm:$0xff]  ;;  %v617_v43 = vld [vmem:[#allocation9 + $0x80] sm:$0xff]  ;;  %v616_v45 = vld [vmem:[#allocation3] sm:$0xff] }
  0x78   : > { %659 = vmatpush.msra.mxu1 %v609_v16  ;;  %v600_v44 = vld [vmem:[#allocation9] sm:$0xff]  ;;  %v599_v46 = vld [vmem:[#allocation2] sm:$0xff]  ;;  %v684_v47 = vld [vmem:[#allocation10 + $0x28] sm:$0xff] }
  0x79   : > { %640 = vmatpush.msra.mxu0 %v625_v19  ;;  %704 = vmatpush.msra.mxu2 %v689_v30  ;;  %v683_v48 = vld [vmem:[#allocation10 + $0x20] sm:$0xff]  ;;  %v682_v49 = vld [vmem:[#allocation10 + $0x18] sm:$0xff]  ;;  %v681_v50 = vld [vmem:[#allocation10 + $0x10] sm:$0xff] }
  0x7a   : > { %660 = vmatpush.msra.mxu1 %v608_v20  ;;  %v680_v51 = vld [vmem:[#allocation10 + $0x8] sm:$0xff]  ;;  %v679_v52 = vld [vmem:[#allocation10] sm:$0xff]  ;;  %v735_v53 = vld [vmem:[#allocation12 + $0x78] sm:$0xff] }
  0x7b   : > { %641 = vmatpush.msra.mxu0 %v624_v22  ;;  %705 = vmatpush.msra.mxu2 %v688_v33  ;;  %v734_v54 = vld [vmem:[#allocation12 + $0x70] sm:$0xff]  ;;  %v733_v55 = vld [vmem:[#allocation12 + $0x68] sm:$0xff]  ;;  %v732_v56 = vld [vmem:[#allocation12 + $0x60] sm:$0xff] }
  0x7c   : > { %661 = vmatpush.msra.mxu1 %v607_v23  ;;  %740 = vmatpush.msra.mxu3 %v735_v53  ;;  %v731_v57 = vld [vmem:[#allocation12 + $0x58] sm:$0xff]  ;;  %v730_v58 = vld [vmem:[#allocation12 + $0x50] sm:$0xff]  ;;  %v729_v59 = vld [vmem:[#allocation12 + $0x48] sm:$0xff] }
  0x7d   : > { %642 = vmatpush.msra.mxu0 %v623_v25  ;;  %706 = vmatpush.msra.mxu2 %v687_v36  ;;  %v728_v60 = vld [vmem:[#allocation12 + $0x40] sm:$0xff]  ;;  %v727_v61 = vld [vmem:[#allocation12 + $0x38] sm:$0xff]  ;;  %v726_v62 = vld [vmem:[#allocation12 + $0x30] sm:$0xff] }
  0x7e   : > { %662 = vmatpush.msra.mxu1 %v606_v26  ;;  %741 = vmatpush.msra.mxu3 %v734_v54  ;;  %v725_v63 = vld [vmem:[#allocation12 + $0x28] sm:$0xff]  ;;  %v724_v0 = vld [vmem:[#allocation12 + $0x20] sm:$0xff]  ;;  %v723_v1 = vld [vmem:[#allocation12 + $0x18] sm:$0xff] }
  0x7f   : > { %643 = vmatpush.msra.mxu0 %v622_v28  ;;  %707 = vmatpush.msra.mxu2 %v686_v39  ;;  %v1012_v2 = vld [vmem:[%s1505_s3] ss:$0 sm:$0xff]  ;;  %v721_v9 = vld [vmem:[#allocation12 + $0x8] sm:$0xff]  ;;  %v720_v10 = vld [vmem:[#allocation12] sm:$0xff] }
  0x80   : > { %663 = vmatpush.msra.mxu1 %v605_v29  ;;  %742 = vmatpush.msra.mxu3 %v733_v55  ;;  %v722_v8 = vld [vmem:[#allocation12 + $0x10] sm:$0xff] }
  0x81   : > { %644 = vmatpush.msra.mxu0 %v621_v31  ;;  %708 = vmatpush.msra.mxu2 %v685_v42  ;;  %v1013_v11 = vld [vmem:[%s1507_s5] ss:$0 sm:$0xff] }
  0x82   : > { %664 = vmatpush.msra.mxu1 %v604_v32  ;;  %743 = vmatpush.msra.mxu3 %v732_v56  ;;  %v1014_v15 = vld [vmem:[%s1509_s7] ss:$0 sm:$0xff] }
  0x83   : > { %645 = vmatpush.msra.mxu0 %v620_v34  ;;  %709 = vmatpush.msra.mxu2 %v684_v47 }
  0x84   : > { %665 = vmatpush.msra.mxu1 %v603_v35  ;;  %744 = vmatpush.msra.mxu3 %v731_v57 }
  0x85   : > { %646 = vmatpush.msra.mxu0 %v619_v37  ;;  %710 = vmatpush.msra.mxu2 %v683_v48 }
  0x86   : > { %666 = vmatpush.msra.mxu1 %v602_v38  ;;  %745 = vmatpush.msra.mxu3 %v730_v58 }
  0x87   : > { %647 = vmatpush.msra.mxu0 %v618_v40  ;;  %711 = vmatpush.msra.mxu2 %v682_v49 }
  0x88   : > { %667 = vmatpush.msra.mxu1 %v601_v41  ;;  %746 = vmatpush.msra.mxu3 %v729_v59 }
  0x89   : > { %648 = vmatpush.msra.mxu0 %v617_v43  ;;  %712 = vmatpush.msra.mxu2 %v681_v50 }
  0x8a   : > { %668 = vmatpush.msra.mxu1 %v600_v44  ;;  %649 = vmatmul.f32.vlgmr.msra.gmra.mxu0 %v616_v45 }
  0x8b   : > { %669 = vmatmul.f32.vlgmr.msra.gmra.mxu1 %v599_v46  ;;  %713 = vmatpush.msra.mxu2 %v680_v51 }
  0x8c   : > { %747 = vmatpush.msra.mxu3 %v728_v60 }
  0x8d   : > { %714 = vmatpush.msra.mxu2 %v679_v52 }
  0x8e   : > { %748 = vmatpush.msra.mxu3 %v727_v61 }
  0x90   : > { %749 = vmatpush.msra.mxu3 %v726_v62 }
  0x92   : > { %750 = vmatpush.msra.mxu3 %v725_v63 }
  0x94   : > { %751 = vmatpush.msra.mxu3 %v724_v0 }
  0x96   : > { %752 = vmatpush.msra.mxu3 %v723_v1 }
  0x98   : > { %753 = vmatpush.msra.mxu3 %v722_v8 }
  0x9a   : > { %754 = vmatpush.msra.mxu3 %v721_v9 }
  0x9c   : > { %755 = vmatpush.msra.mxu3 %v720_v10 }
 0x107   : > { %v650_v3 = vpop.f32.mrf.mxu0 }
 0x108   : > { %v670_v4 = vpop.f32.mrf.mxu1 }
 0x109   : > { %v671_v5 = vadd.f32 %v670_v4, %v650_v3 }
 0x10b   : > { %v677_v6 = vadd.f32 %v1012_v2, %v671_v5 }
 0x10d   : > { %v678_v7 = vmax.f32 %v677_v6, 0.0 }
 0x10f   : > { %715 = vmatmul.f32.vlgmr.msra.gmra.mxu2 %v678_v7 }
 0x192   : > { %v716_v12 = vpop.f32.mrf.mxu2 }
 0x193   : > { %v717_v13 = vadd.f32 %v1013_v11, %v716_v12 }
 0x195   : > { %v719_v14 = vmax.f32 %v717_v13, 0.0 }
 0x197   : > { %756 = vmatmul.f32.vlgmr.msra.gmra.mxu3 %v719_v14 }
 0x21a   : > { %v757_v16 = vpop.f32.mrf.mxu3 }
 0x21b   : > { %v758_v17 = vadd.f32 %v1014_v15, %v757_v16 }
 0x21d   : > { %760 = vst [vmem:[#allocation13] sm:$0xff] %v758_v17 }
 0x21e PF: > { %p954_p3 = scmp.eq.s32.totalorder %s1343_s11, 3  ;;  %s771_s19 = sshll.u32 %s1510_s8, 4  ;;  %s772_s19 = int_to_ptr.hbm [resolvable:$true] %s771_s19 }
 0x21f   : > { %s1268_s18 = smov [#allocation13]  }
 0x220   : > { %s769_s13 = sshll.u32 %s1268_s18, 4  ;;  %s770_s13 = int_to_ptr.vmem [resolvable:$true] %s769_s13 }
 0x221   : > { %927 = dma.vmem_to_hbm [thread:$0]  (%p954_p3), %s770_s13, 128, %s772_s19, [#allocation6]  }
 0x222   : > { %1234 = dma.done.wait (%p954_p3), [#allocation6], 128  }
 0x223   : > { %1236 = vsyncadd (%p954_p3), [#allocation6], 4294967168 }
 0x224 PF: > { %s26_s10 = sadd.s32 1, %s1259_s10   ;;  %s1532_s14 = sld [smem:[#allocation21_spill]] }
 0x225   : > { %p23_p4 = scmp.ge.s32.totalorder %s26_s10, 6   ;;  %s1533_s30 = sld [smem:[#allocation19_spill]] }
 0x226   : > { %s1534_s9 = sld [smem:[#allocation20_spill]]  ;;  %s1535_s27 = smov %s1243_s28 }
 0x227   : > { %s1536_s28 = smov %s1247_s29  ;;  %25 = sbr.rel (!%p23_p4) target bundleno = 12 (0xc), region = 123 }
 0x22a   : > { %s1537_s29 = smov %s1532_s14 }
 0x22c   :  { %785 = vsyncpa [#allocation5], 1 }
 0x22d   :  { %787 = vsyncpa [#allocation5 + $0x1], 1 }
 0x22e   :  { %788 = vsyncpa [#allocation8], 1 }
 0x22f   :  { %790 = vsyncpa [#allocation8 + $0x1], 1 }
 0x230   :  { %791 = vsyncpa [#allocation11], 1 }
 0x231   :  { %792 = vsyncpa [#allocation6], 1 }
 0x232   :  { %794 = vsyncpa [#allocation6 + $0x1], 1 }

</bundles_post_ra>
